<compile_context>
chip_gen: v7x
topology: tpu7x:2x2x1
jax: 0.10.0
libtpu: 0.0.40
codegen_flags: <defaults>
</compile_context>

<pallas_src>
import jax
import jax.numpy as jnp
from jax.experimental import pallas as pl
from jax.experimental.pallas import tpu as pltpu


def _linear_nobias_kernel(x_ref, w_ref, o_ref):
    # x_ref: (tm, rep_dim)        f32 batch tile (cast to compute dtype here)
    # w_ref: (rep_dim, input_dim) bf16 full weight (already W^T), VMEM-resident
    # o_ref: (tm, input_dim)      output tile
    x = x_ref[...].astype(w_ref.dtype)          # VPU cast, no extra HBM pass
    y = jnp.dot(x, w_ref[...], preferred_element_type=jnp.float32)
    o_ref[...] = y.astype(o_ref.dtype)


def _round_up(n, m):
    return ((n + m - 1) // m) * m


def _pick_tm(batch, cap=4096):
    """8-aligned batch tile; >=2 grid steps when batch is big enough (v7x 2 TCs)."""
    if batch <= 16:
        return _round_up(batch, 8)
    half = _round_up(pl.cdiv(batch, 2), 8)
    return max(8, min(cap, half))


def mlp_decoder_forward(x, weight, *, tm=None, compute_dtype=jnp.bfloat16,
                        out_dtype=None, force_pallas=False):
    """y = x @ weight.T  (nn.Linear(rep_dim, input_dim, bias=False)).

    x:      (batch, rep_dim)     any float dtype (kept as-is in HBM)
    weight: (input_dim, rep_dim) PyTorch nn.Linear layout
    out_dtype: defaults to x.dtype; pass jnp.bfloat16 as the perf mode
               (halves output HBM traffic, which dominates bytes here).
    """
    batch, rep_dim = x.shape
    input_dim, rep_dim_w = weight.shape
    assert rep_dim == rep_dim_w
    out_dtype = x.dtype if out_dtype is None else out_dtype

    # One-time, trace-time weight prep: canonical [K, N] layout, narrow dtype.
    # The weight is only input_dim*rep_dim elements (8-16 KiB) -> negligible.
    w_t = weight.T.astype(compute_dtype)

    # Tiny problems are launch-overhead bound -> plain XLA dot.
    if not force_pallas and batch * input_dim < (1 << 16):
        y = jnp.dot(x.astype(compute_dtype), w_t,
                    preferred_element_type=jnp.float32)
        return y.astype(out_dtype)

    if tm is None:
        tm = _pick_tm(batch)
    tm = min(_round_up(tm, 8), _round_up(batch, 8))
    grid = (pl.cdiv(batch, tm),)   # ragged last block is masked by Pallas

    cost = pl.CostEstimate(
        flops=2 * batch * rep_dim * input_dim,
        transcendentals=0,
        bytes_accessed=(
            batch * rep_dim * x.dtype.itemsize                    # x read (real dtype)
            + rep_dim * input_dim * jnp.dtype(compute_dtype).itemsize  # W read once
            + batch * input_dim * jnp.dtype(out_dtype).itemsize   # y written
        ),
    )

    return pl.pallas_call(
        _linear_nobias_kernel,
        out_shape=jax.ShapeDtypeStruct((batch, input_dim), out_dtype),
        grid=grid,
        in_specs=[
            # x: walk the batch axis; last dim == full rep_dim (no (8,128) issue).
            pl.BlockSpec((tm, rep_dim), lambda i: (i, 0)),
            # W^T: full-extent block, constant index_map -> DMA'd once, resident.
            pl.BlockSpec((rep_dim, input_dim), lambda i: (0, 0)),
        ],
        out_specs=pl.BlockSpec((tm, input_dim), lambda i: (i, 0)),
        compiler_params=pltpu.CompilerParams(
            dimension_semantics=("parallel",),
        ),
        cost_estimate=cost,
    )(x, w_t)


if __name__ == "__main__":
    # Shapes consistent with the module: rep_dim=32, input_dim=128.
    rep_dim, input_dim = 32, 128

    key = jax.random.PRNGKey(0)
    kx, kw, kx2 = jax.random.split(key, 3)

    bound = 1.0 / jnp.sqrt(jnp.float32(rep_dim))
    weight = jax.random.uniform(
        kw, (input_dim, rep_dim), minval=-bound, maxval=bound, dtype=jnp.float32
    )

    # --- Case 1: nominal tiny batch (batch=8) -> exercises the Pallas kernel
    # explicitly (force_pallas) plus the overhead-avoiding fallback.
    batch = 8
    x = jax.random.normal(kx, (batch, rep_dim), dtype=jnp.float32)
    y_ref = x @ weight.T

    y_pallas = jax.block_until_ready(mlp_decoder_forward(x, weight, force_pallas=True))
    assert y_pallas.shape == (batch, input_dim)
    assert jnp.allclose(y_pallas, y_ref, atol=3e-2, rtol=3e-2), float(
        jnp.max(jnp.abs(y_pallas - y_ref)))

    y_fb = jax.block_until_ready(mlp_decoder_forward(x, weight))
    assert jnp.allclose(y_fb, y_ref, atol=3e-2, rtol=3e-2)

    # --- Case 2: ragged batch (not a multiple of 8 or of tm) -> exercises
    # cdiv grid + masked last block in the Pallas path.
    batch2 = 300
    x2 = jax.random.normal(kx2, (batch2, rep_dim), dtype=jnp.float32)
    y2 = jax.block_until_ready(mlp_decoder_forward(x2, weight, force_pallas=True))
    y2_ref = x2 @ weight.T
    assert y2.shape == (batch2, input_dim)
    assert jnp.allclose(y2, y2_ref, atol=3e-2, rtol=3e-2), float(
        jnp.max(jnp.abs(y2 - y2_ref)))

    print("KERNEL_OK")
</pallas_src>

<mosaic_0001>
module attributes {stable_mosaic.version = 11 : i64} {
  func.func @_linear_nobias_kernel(%arg0: i32, %arg1: memref<8x32xf32, #tpu.memory_space<vmem>>, %arg2: memref<32x128xbf16, #tpu.memory_space<vmem>>, %arg3: memref<8x128xf32, #tpu.memory_space<vmem>>) attributes {dimension_semantics = [#tpu.dimension_semantics<parallel>], iteration_bounds = array<i64: 1>, scalar_prefetch = 0 : i64, scratch_operands = 0 : i64, tpu.core_type = #tpu.core_type<tc>, window_params = [{transform_indices = @transform_0, window_bounds = array<i64: 8, 32>}, {pipeline_mode = #tpu.pipeline_mode<synchronous>, transform_indices = @transform_1, window_bounds = array<i64: 32, 128>}, {transform_indices = @transform_2, window_bounds = array<i64: 8, 128>}]} {
    %c0 = arith.constant 0 : index
    %c0_0 = arith.constant 0 : index
    %0 = vector.load %arg1[%c0, %c0_0] : memref<8x32xf32, #tpu.memory_space<vmem>>, vector<8x32xf32>
    %1 = arith.truncf %0 : vector<8x32xf32> to vector<8x32xbf16>
    %c0_1 = arith.constant 0 : index
    %c0_2 = arith.constant 0 : index
    %2 = vector.load %arg2[%c0_1, %c0_2] : memref<32x128xbf16, #tpu.memory_space<vmem>>, vector<32x128xbf16>
    %cst = arith.constant dense<0.000000e+00> : vector<8x128xf32>
    %3 = tpu.matmul %1, %2, %cst {dimension_numbers = #tpu.dot_dimension_numbers<[1], [0], [0], [1], [0, 0, 1, 1], [], []>} : vector<8x32xbf16>, vector<32x128xbf16>, vector<8x128xf32> -> vector<8x128xf32>
    %c0_3 = arith.constant 0 : index
    %c0_4 = arith.constant 0 : index
    %4 = vector.load %arg3[%c0_3, %c0_4] : memref<8x128xf32, #tpu.memory_space<vmem>>, vector<8x128xf32>
    tpu.vector_store %arg3[%c0_3, %c0_4], %3 {strides = array<i32>} : memref<8x128xf32, #tpu.memory_space<vmem>>, vector<8x128xf32>,
    return
  }
  func.func @transform_0(%arg0: i32) -> (i32, i32) {
    %c0_i32 = arith.constant 0 : i32
    %c0_i32_0 = arith.constant 0 : i32
    return %arg0, %c0_i32 : i32, i32
  }
  func.func @transform_1(%arg0: i32) -> (i32, i32) {
    %c0_i32 = arith.constant 0 : i32
    %c0_i32_0 = arith.constant 0 : i32
    %c0_i32_1 = arith.constant 0 : i32
    return %c0_i32, %c0_i32_0 : i32, i32
  }
  func.func @transform_2(%arg0: i32) -> (i32, i32) {
    %c0_i32 = arith.constant 0 : i32
    %c0_i32_0 = arith.constant 0 : i32
    return %arg0, %c0_i32 : i32, i32
  }
}

</mosaic_0001>

<bundles_post_ra>
// kernel: tpu_custom_call.1
= control target key start
LH: loop header
LB: loop body
LE: loop exit
PB: predicated region body
PF: predicated region fallthrough
CT: control target
= control target key end

     0   :  { %7 = vsyncpa [#allocation3], 0  ;;  %s278_s0 = inlined_call_operand.hbm [shape: f32[8,32], index: 0, kind: input, shape index: {}]   ;;  %s279_s1 = inlined_call_operand.hbm [shape: bf16[32,128], index: 1, kind: input, shape index: {}]   ;;  %s280_s2 = inlined_call_operand.hbm [shape: f32[8,128], index: 2, kind: output, shape index: {}]  }
   0x1   :  { %8 = vsyncpa [#allocation6], 0 }
   0x2   :  { %9 = vsyncpa [#allocation4], 0  ;;  %s213_s9 = smov [#allocation2]   ;;  %s214_s11 = smov [#allocation5]  }
   0x3   :  { %s16_s10 = sshll.u32 %s213_s9, 4  ;;  %s25_s12 = sshll.u32 %s214_s11, 4  ;;  %s17_s10 = int_to_ptr.vmem [resolvable:$true] %s16_s10  ;;  %s235_s12 = int_to_ptr.vmem [resolvable:$true] %s25_s12 }
   0x4   :  { %s141_s15 = scalar_lea.hbm %s278_s0, 128 }
   0x5   :  { %p142_p0 = scmp.ne.s32.totalorder %s278_s0, %s141_s15  ;;  %p145_p1 = scmp.lt.u32.totalorder %s141_s15, %s278_s0 }
   0x7   :  { %p147_p2 = pnand %p145_p1, %p142_p0 }
   0x9   :  { %150 = shalt.err (!%p147_p2)
}
   0xa   :  { %s151_s20 = scalar_lea.vmem %s17_s10, 128  ;;  %p156_p4 = scmp.lt.s32.totalorder %s17_s10, %s17_s10 }
   0xb   :  { %p152_p3 = scmp.ne.s32.totalorder %s17_s10, %s151_s20  ;;  %p157_p5 = scmp.lt.s32.totalorder %s151_s20, %s151_s20 }
   0xd   :  { %p158_p6 = por %p157_p5, %p156_p4 }
   0xf   :  { %p159_p7 = pnand %p158_p6, %p152_p3 }
  0x11   :  { %162 = shalt.err (!%p159_p7)
}
  0x12   :  { %19 = dma.hbm_to_vmem [thread:$0]  %s278_s0, 128, %s17_s10, [#allocation3]  }
  0x13   :  { %s163_s25 = scalar_lea.hbm %s279_s1, 256 }
  0x14   :  { %p164_p8 = scmp.ne.s32.totalorder %s279_s1, %s163_s25  ;;  %p167_p9 = scmp.lt.u32.totalorder %s163_s25, %s279_s1 }
  0x16   :  { %p169_p10 = pnand %p167_p9, %p164_p8 }
  0x18   :  { %172 = shalt.err (!%p169_p10)
}
  0x19   :  { %s173_s30 = scalar_lea.vmem %s235_s12, 256  ;;  %p178_p12 = scmp.lt.s32.totalorder %s235_s12, %s235_s12 }
  0x1a   :  { %p174_p11 = scmp.ne.s32.totalorder %s235_s12, %s173_s30  ;;  %p179_p13 = scmp.lt.s32.totalorder %s173_s30, %s173_s30 }
  0x1c   :  { %p180_p0 = por %p179_p13, %p178_p12 }
  0x1e   :  { %p181_p1 = pnand %p180_p0, %p174_p11 }
  0x20   :  { %184 = shalt.err (!%p181_p1)
}
  0x21   :  { %s215_s0 = smov 64   ;;  %s216_s3 = smov 4  }
  0x22   :  { %31 = dma.hbm_to_vmem [thread:$0]  %s279_s1, 256, %s235_s12, [#allocation6], %s215_s0, %s215_s0, %s216_s3  }
  0x23   :  { %207 = dma.done.wait [#allocation3], 128  }
  0x24   :  { %208 = vsyncadd [#allocation3], 4294967168 }
  0x25   :  { %209 = dma.done.wait [#allocation6], 256  }
  0x26   :  { %210 = vsyncadd [#allocation6], 4294967040  ;;  %v217_v0 = vmov 0.0   ;;  %vm218_vm0 = vmmov 0   ;;  %v139_v1 = vld [vmem:[#allocation5] sm:$0xff]   ;;  %v140_v2 = vld [vmem:[#allocation5 + $0x8] sm:$0xff]  }
  0x27   :  { %124 = vmatprep.subr.bf16.mxu0 %v217_v0  ;;  %128 = vmatprep.mubr.msk.bf16.mxu0 %vm218_vm0, %v217_v0  ;;  %v39_v3 = vld [vmem:[#allocation2] sm:$0xff]  ;;  %vm57_vm1 = vcmask 261120   ;;  %s219_s6 = smov [#allocation7]  }
  0x28   :  { %125 = vmatpush3.bf16.msra.mxu0 %v139_v1  ;;  %v40_v4 = vpack.c.bf16 %v39_v3, %v39_v3  ;;  %s108_s7 = sshll.u32 %s219_s6, 4  ;;  %s109_s7 = int_to_ptr.vmem [resolvable:$true] %s108_s7 }
  0x29   :  { %126 = vmatprep.subr.bf16.mxu0 %v217_v0  ;;  %s185_s1 = scalar_lea.vmem %s109_s7, 128  ;;  %p190_p3 = scmp.lt.s32.totalorder %s109_s7, %s109_s7 }
  0x2a   :  { %p186_p2 = scmp.ne.s32.totalorder %s109_s7, %s185_s1  ;;  %p191_p4 = scmp.lt.s32.totalorder %s185_s1, %s185_s1 }
  0x2c   :  { %127 = vmatpush3.bf16.msra.mxu0 %v140_v2  ;;  %p192_p5 = por %p191_p4, %p190_p3 }
  0x2e   :  { %p193_p6 = pnand %p192_p5, %p186_p2 }
  0x2f   :  { %129 = vmatmul.mubr.msk.bf16.vlgmr.msra.gmra.mrb[0].mxu0 %vm57_vm1, %v40_v4 }
 0x102   :  { %v95_v5 = vpop.f32.mrb[0].mxu0 }
 0x103   :  { %101 = vst [vmem:[#allocation7] sm:$0xff] %v95_v5  ;;  %v130_v6 = vpop.f32.mrb[1].mxu0 }
 0x104   :  { %v98_v7 = vpop.f32.mrb[2].mxu0 }
 0x105   :  { %196 = shalt.err (!%p193_p6)
}
 0x106   :  { %s197_s10 = scalar_lea.hbm %s280_s2, 128 }
 0x107   :  { %p198_p7 = scmp.ne.s32.totalorder %s280_s2, %s197_s10  ;;  %p201_p8 = scmp.lt.u32.totalorder %s197_s10, %s280_s2 }
 0x109   :  { %p203_p9 = pnand %p201_p8, %p198_p7 }
 0x10b   :  { %206 = shalt.err (!%p203_p9)
}
 0x10c   :  { %111 = dma.vmem_to_hbm [thread:$0]  %s109_s7, 128, %s280_s2, [#allocation4]   ;;  %v131_v8 = vpop.f32.mrb[3].mxu0 }
 0x10d   :  { %211 = dma.done.wait [#allocation4], 128  }
 0x10e   :  { %212 = vsyncadd [#allocation4], 4294967168 }
 0x10f   :  { %115 = vsyncpa [#allocation3], 1 }
 0x110   :  { %116 = vsyncpa [#allocation6], 1 }
 0x111   :  { %117 = vsyncpa [#allocation4], 1 }

</bundles_post_ra>
